<compile_context>
chip_gen: v5e
topology: v5e:2x2
jax: 0.10.0
libtpu: 0.0.40
codegen_flags: <defaults>
</compile_context>

<pallas_src>
import functools

import jax
import jax.numpy as jnp
from jax import lax
from jax.experimental import pallas as pl
from jax.experimental.pallas import tpu as pltpu


def _round_up(n, m):
    return (n + m - 1) // m * m


# ----------------------------------------------------------------------------
# Fused kernel: conv1x1 -> ReLU -> conv1x1 -> ReLU -> residual subtract
# ----------------------------------------------------------------------------
def _residual_dense_kernel(x_ref, w1_ref, b1_ref, w2_ref, b2_ref, o_ref, *,
                           n_b, n_chunks, chunk):
    # x:  (Bblk, Cin, T) f32     w1: (Chid, Cin) bf16   b1: (Chid, 1) f32
    # w2: (Cin, Chid)   bf16     b2: (Cin, 1)  f32      o:  (Bblk, Cin, T) f32
    w1 = w1_ref[...]                      # resident weights (hoisted loads)
    w2 = w2_ref[...]
    b1 = b1_ref[...]
    b2 = b2_ref[...]

    def one_chunk(bi, off):
        x = x_ref[bi, :, pl.ds(off, chunk)]                         # (Cin, chunk) f32
        h = jnp.dot(w1, x.astype(jnp.bfloat16),
                    preferred_element_type=jnp.float32) + b1
        h = jnp.maximum(h, 0.0)                                     # ReLU #1
        y = jnp.dot(w2, h.astype(jnp.bfloat16),
                    preferred_element_type=jnp.float32) + b2
        y = jnp.maximum(y, 0.0)                                     # ReLU #2
        o_ref[bi, :, pl.ds(off, chunk)] = (x - y).astype(o_ref.dtype)

    for bi in range(n_b):                 # static, small (<= 8)
        if n_chunks == 1:
            one_chunk(bi, 0)
        else:
            def body(c, carry):
                one_chunk(bi, pl.multiple_of(c * chunk, 128))
                return carry
            lax.fori_loop(0, n_chunks, body, 0, unroll=(n_chunks <= 8))


def residual_dense(x, w1, b1, w2, b2, *, target_block_bytes=2 << 20, buffers=2):
    """Forward of ResidualDense.  x: [B, Cin, H, W] (NCHW, f32).

    w1: [Chid, Cin, 1, 1], b1: [Chid]   (first 1x1 conv)
    w2: [Cin, Chid, 1, 1], b2: [Cin]    (second 1x1 conv)
    """
    B, Cin, H, W = x.shape
    Chid = w1.shape[0]
    HW = H * W
    x3 = x.reshape(B, Cin, HW)                       # free reshape, stays NCHW

    # MXU-friendly operand dtypes; biases stay f32 (added to the f32 accumulator).
    w1m = w1.reshape(Chid, Cin).astype(jnp.bfloat16)
    w2m = w2.reshape(Cin, Chid).astype(jnp.bfloat16)
    b1m = b1.reshape(Chid, 1).astype(jnp.float32)
    b2m = b2.reshape(Cin, 1).astype(jnp.float32)

    # ---- DMA tiling: ~target_block_bytes of X per grid step ----------------
    hw_pad = _round_up(HW, 128)
    lanes = max(128, target_block_bytes // (4 * Cin))
    if lanes >= hw_pad:
        t = hw_pad                                    # whole spatial extent ...
        bblk = max(1, min(B, lanes // t, 8))          # ... fattened with batch
    else:
        t = _round_up(min(lanes, hw_pad), 128)
        bblk = 1

    # Keep >=2 grid steps on a parallel axis when there is work to split (v7x).
    if pl.cdiv(B, bblk) * pl.cdiv(HW, t) < 2:
        if B > 1:
            bblk = (B + 1) // 2
        elif hw_pad > 128:
            t = _round_up(pl.cdiv(HW, 2), 128)

    # ---- compute chunking: bound the (Chid, chunk) f32 intermediate --------
    cmax = max(Chid, Cin)
    chunk = 512
    while chunk > 128 and chunk * cmax * 4 > (64 << 10):
        chunk //= 2
    chunk = min(chunk, t)
    while t % chunk != 0:                             # chunk is 2^k * 128 -> terminates
        chunk //= 2
    n_chunks = t // chunk

    grid = (pl.cdiv(B, bblk), pl.cdiv(HW, t))

    # ---- VMEM budget: buffered in/out blocks + resident weights + headroom --
    block_bytes = bblk * Cin * t * 4
    vmem_need = (2 * buffers * block_bytes
                 + 2 * (w1m.size + w2m.size) + 4 * (Chid + Cin)
                 + 8 * chunk * (Chid + Cin))
    vmem_limit = int(min(64 << 20, max(32 << 20, 2 * vmem_need)))

    def _io_spec():
        if buffers == 2:
            return pl.BlockSpec((bblk, Cin, t), lambda b, i: (b, 0, i))
        return pl.BlockSpec((bblk, Cin, t), lambda b, i: (b, 0, i),
                            pipeline_mode=pl.Buffered(buffers))

    kernel = functools.partial(_residual_dense_kernel,
                               n_b=bblk, n_chunks=n_chunks, chunk=chunk)

    out = pl.pallas_call(
        kernel,
        out_shape=jax.ShapeDtypeStruct((B, Cin, HW), jnp.float32),
        grid=grid,
        in_specs=[
            _io_spec(),                                          # X slab
            pl.BlockSpec((Chid, Cin), lambda b, i: (0, 0)),      # W1 (resident)
            pl.BlockSpec((Chid, 1), lambda b, i: (0, 0)),        # b1
            pl.BlockSpec((Cin, Chid), lambda b, i: (0, 0)),      # W2 (resident)
            pl.BlockSpec((Cin, 1), lambda b, i: (0, 0)),         # b2
        ],
        out_specs=_io_spec(),
        compiler_params=pltpu.CompilerParams(
            dimension_semantics=("parallel", "parallel"),
            vmem_limit_bytes=vmem_limit),
    )(x3, w1m, b1m, w2m, b2m)
    return out.reshape(B, Cin, H, W)


# ----------------------------------------------------------------------------
# Plain-JAX reference (f32) mirroring the PyTorch module exactly
# ----------------------------------------------------------------------------
def _reference(x, w1, b1, w2, b2):
    B, Cin, H, W = x.shape
    Chid = w1.shape[0]
    xm = x.reshape(B, Cin, H * W)
    h = jnp.maximum(
        jnp.einsum("oc,bcn->bon", w1.reshape(Chid, Cin), xm) + b1[None, :, None], 0.0)
    y = jnp.maximum(
        jnp.einsum("oc,bcn->bon", w2.reshape(Cin, Chid), h) + b2[None, :, None], 0.0)
    return (xm - y).reshape(B, Cin, H, W)


# ----------------------------------------------------------------------------
if __name__ == "__main__":
    key = jax.random.PRNGKey(0)
    kx, k1, k2, k3, k4 = jax.random.split(key, 5)

    B, Cin, H, W = 2, 4, 16, 16
    Chid = 32

    X = jax.random.normal(kx, (B, Cin, H, W), jnp.float32)
    w1 = jax.random.normal(k1, (Chid, Cin, 1, 1), jnp.float32) / jnp.sqrt(Cin)
    b1 = jax.random.normal(k2, (Chid,), jnp.float32) * 0.1
    w2 = jax.random.normal(k3, (Cin, Chid, 1, 1), jnp.float32) / jnp.sqrt(Chid)
    b2 = jax.random.normal(k4, (Cin,), jnp.float32) * 0.1

    fwd = jax.jit(residual_dense)
    y = fwd(X, w1, b1, w2, b2)
    jax.block_until_ready(y)

    assert y.shape == (B, Cin, H, W), y.shape
    assert bool(jnp.all(jnp.isfinite(y))), "non-finite output"

    # Loose tolerance accounts for the intentional bf16 cast of the MXU operands
    # (error grows with Cin/Chid; exact at this small test size).
    y_ref = _reference(X, w1, b1, w2, b2)
    max_err = float(jnp.max(jnp.abs(y - y_ref)))
    assert max_err < 1e-1, f"max abs error vs f32 reference too large: {max_err}"

    print("KERNEL_OK")
</pallas_src>

<mosaic_0001>
module attributes {stable_mosaic.version = 11 : i64} {
  func.func @_residual_dense_kernel(%arg0: i32, %arg1: i32, %arg2: memref<1x4x256xf32, #tpu.memory_space<vmem>>, %arg3: memref<32x4xbf16, #tpu.memory_space<vmem>>, %arg4: memref<32x1xf32, #tpu.memory_space<vmem>>, %arg5: memref<4x32xbf16, #tpu.memory_space<vmem>>, %arg6: memref<4x1xf32, #tpu.memory_space<vmem>>, %arg7: memref<1x4x256xf32, #tpu.memory_space<vmem>>) attributes {dimension_semantics = [#tpu.dimension_semantics<parallel>, #tpu.dimension_semantics<parallel>], iteration_bounds = array<i64: 2, 1>, scalar_prefetch = 0 : i64, scratch_operands = 0 : i64, tpu.core_type = #tpu.core_type<tc>, window_params = [{transform_indices = @transform_0, window_bounds = array<i64: 1, 4, 256>}, {pipeline_mode = #tpu.pipeline_mode<synchronous>, transform_indices = @transform_1, window_bounds = array<i64: 32, 4>}, {pipeline_mode = #tpu.pipeline_mode<synchronous>, transform_indices = @transform_2, window_bounds = array<i64: 32, 1>}, {pipeline_mode = #tpu.pipeline_mode<synchronous>, transform_indices = @transform_3, window_bounds = array<i64: 4, 32>}, {pipeline_mode = #tpu.pipeline_mode<synchronous>, transform_indices = @transform_4, window_bounds = array<i64: 4, 1>}, {transform_indices = @transform_5, window_bounds = array<i64: 1, 4, 256>}]} {
    %c0 = arith.constant 0 : index
    %c0_0 = arith.constant 0 : index
    %0 = vector.load %arg3[%c0, %c0_0] : memref<32x4xbf16, #tpu.memory_space<vmem>>, vector<32x4xbf16>
    %c0_1 = arith.constant 0 : index
    %c0_2 = arith.constant 0 : index
    %1 = vector.load %arg5[%c0_1, %c0_2] : memref<4x32xbf16, #tpu.memory_space<vmem>>, vector<4x32xbf16>
    %c0_3 = arith.constant 0 : index
    %c0_4 = arith.constant 0 : index
    %2 = vector.load %arg4[%c0_3, %c0_4] : memref<32x1xf32, #tpu.memory_space<vmem>>, vector<32x1xf32>
    %c0_5 = arith.constant 0 : index
    %c0_6 = arith.constant 0 : index
    %3 = vector.load %arg6[%c0_5, %c0_6] : memref<4x1xf32, #tpu.memory_space<vmem>>, vector<4x1xf32>
    %c0_7 = arith.constant 0 : index
    %c0_8 = arith.constant 0 : index
    %c0_9 = arith.constant 0 : index
    %4 = vector.load %arg2[%c0_7, %c0_8, %c0_9] : memref<1x4x256xf32, #tpu.memory_space<vmem>>, vector<1x4x256xf32>
    %5 = vector.shape_cast %4 : vector<1x4x256xf32> to vector<4x256xf32>
    %6 = arith.truncf %5 : vector<4x256xf32> to vector<4x256xbf16>
    %cst = arith.constant dense<0.000000e+00> : vector<32x256xf32>
    %7 = tpu.matmul %0, %6, %cst {dimension_numbers = #tpu.dot_dimension_numbers<[1], [0], [0], [1], [0, 0, 1, 1], [], []>} : vector<32x4xbf16>, vector<4x256xbf16>, vector<32x256xf32> -> vector<32x256xf32>
    %8 = vector.broadcast %2 : vector<32x1xf32> to vector<32x256xf32>
    %9 = arith.addf %7, %8 : vector<32x256xf32>
    %cst_10 = arith.constant 0.000000e+00 : f32
    %10 = vector.broadcast %cst_10 : f32 to vector<32x256xf32>
    %11 = arith.maximumf %9, %10 : vector<32x256xf32>
    %12 = arith.truncf %11 : vector<32x256xf32> to vector<32x256xbf16>
    %cst_11 = arith.constant dense<0.000000e+00> : vector<4x256xf32>
    %13 = tpu.matmul %1, %12, %cst_11 {dimension_numbers = #tpu.dot_dimension_numbers<[1], [0], [0], [1], [0, 0, 1, 1], [], []>} : vector<4x32xbf16>, vector<32x256xbf16>, vector<4x256xf32> -> vector<4x256xf32>
    %14 = vector.broadcast %3 : vector<4x1xf32> to vector<4x256xf32>
    %15 = arith.addf %13, %14 : vector<4x256xf32>
    %cst_12 = arith.constant 0.000000e+00 : f32
    %16 = vector.broadcast %cst_12 : f32 to vector<4x256xf32>
    %17 = arith.maximumf %15, %16 : vector<4x256xf32>
    %18 = arith.subf %5, %17 : vector<4x256xf32>
    %c0_13 = arith.constant 0 : index
    %c0_14 = arith.constant 0 : index
    %c0_15 = arith.constant 0 : index
    %19 = vector.load %arg7[%c0_13, %c0_14, %c0_15] : memref<1x4x256xf32, #tpu.memory_space<vmem>>, vector<1x4x256xf32>
    %20 = vector.shape_cast %19 : vector<1x4x256xf32> to vector<4x256xf32>
    %21 = vector.shape_cast %18 : vector<4x256xf32> to vector<1x4x256xf32>
    tpu.vector_store %arg7[%c0_13, %c0_14, %c0_15], %21 {strides = array<i32>} : memref<1x4x256xf32, #tpu.memory_space<vmem>>, vector<1x4x256xf32>,
    return
  }
  func.func @transform_0(%arg0: i32, %arg1: i32) -> (i32, i32, i32) {
    %c0_i32 = arith.constant 0 : i32
    %c0_i32_0 = arith.constant 0 : i32
    return %arg0, %c0_i32, %arg1 : i32, i32, i32
  }
  func.func @transform_1(%arg0: i32, %arg1: i32) -> (i32, i32) {
    %c0_i32 = arith.constant 0 : i32
    %c0_i32_0 = arith.constant 0 : i32
    %c0_i32_1 = arith.constant 0 : i32
    return %c0_i32, %c0_i32_0 : i32, i32
  }
  func.func @transform_2(%arg0: i32, %arg1: i32) -> (i32, i32) {
    %c0_i32 = arith.constant 0 : i32
    %c0_i32_0 = arith.constant 0 : i32
    %c0_i32_1 = arith.constant 0 : i32
    return %c0_i32, %c0_i32_0 : i32, i32
  }
  func.func @transform_3(%arg0: i32, %arg1: i32) -> (i32, i32) {
    %c0_i32 = arith.constant 0 : i32
    %c0_i32_0 = arith.constant 0 : i32
    %c0_i32_1 = arith.constant 0 : i32
    return %c0_i32, %c0_i32_0 : i32, i32
  }
  func.func @transform_4(%arg0: i32, %arg1: i32) -> (i32, i32) {
    %c0_i32 = arith.constant 0 : i32
    %c0_i32_0 = arith.constant 0 : i32
    %c0_i32_1 = arith.constant 0 : i32
    return %c0_i32, %c0_i32_0 : i32, i32
  }
  func.func @transform_5(%arg0: i32, %arg1: i32) -> (i32, i32, i32) {
    %c0_i32 = arith.constant 0 : i32
    %c0_i32_0 = arith.constant 0 : i32
    return %arg0, %c0_i32, %arg1 : i32, i32, i32
  }
}

</mosaic_0001>

<bundles_post_ra>
// kernel: residual_dense.1
= control target key start
LH: loop header
LB: loop body
LE: loop exit
PB: predicated region body
PF: predicated region fallthrough
CT: control target
= control target key end

     0   :  { %s622_s18 = smov 0   ;;  %s624_s19 = smov 0   ;;  %s690_s0 = inlined_call_operand.vmem [shape: f32[2,4,256], index: 0, kind: input, shape index: {}]   ;;  %s691_s1 = inlined_call_operand.vmem [shape: bf16[32,4], index: 1, kind: input, shape index: {}]   ;;  %s692_s2 = inlined_call_operand.vmem [shape: f32[32,1], index: 2, kind: input, shape index: {}]   ;;  %s693_s3 = inlined_call_operand.vmem [shape: bf16[4,32], index: 3, kind: input, shape index: {}]   ;;  %s694_s4 = inlined_call_operand.vmem [shape: f32[4,1], index: 4, kind: input, shape index: {}]   ;;  %s695_s5 = inlined_call_operand.vmem [shape: f32[2,4,256], index: 5, kind: output, shape index: {}]  }
   0x1   :  { %s626_s20 = smov 0  }
   0x2 LB: > { %s27_s21 = sadd.s32 1, %s585_s19  ;;  %p514_p0 = scmp.ge.s32.totalorder %s589_s20, 1  ;;  %s589_s20 = sphi %s626_s20, %s15_s20   ;;  %s585_s19 = sphi %s624_s19, %s697_s19   ;;  %s581_s18 = sphi %s622_s18, %s696_s18  }
   0x3   : > { %p29_p1 = scmp.ge.s32.totalorder %s27_s21, 2  ;;  %p208_p2 = scmp.lt.s32.totalorder %s589_s20, 3 }
   0x5   : > { %s699_s21 = smov (%p29_p1, %s27_s21), 0  ;;  %p209_p3 = pnand %p514_p0, %p208_p2 }
   0x6   : > { %p245_p4 = scmp.lt.s32.totalorder (!%p209_p3), %s581_s18, 1 }
   0x7   : > { %212 = sbr.rel (%p209_p3) target bundleno = 335 (0x14f), region = 40 }
   0xc   : > { %v270_v0 = vld [vmem:[%s692_s2] sm:$0xff]  ;;  %v591_v1 = vmov 0   ;;  %s701_s18 = smov (!%p245_p4, %s581_s18), 1  ;;  %v272_v2 = vld [vmem:[%s692_s2 + $0x10] sm:$0xff]  ;;  %v271_v4 = vld [vmem:[%s692_s2 + $0x8] sm:$0xff]  ;;  %vm321_vm0 = vcmask 1041408  }
   0xd   : > { %565 = vset.pattern.permute.xlu1 %v591_v1  ;;  %564 = vset.pattern.permute.xlu0 %v591_v1  ;;  %s535_s24 = sshll.u32 %s701_s18, 3  ;;  %v273_v5 = vld [vmem:[%s692_s2 + $0x18] sm:$0xff]  ;;  %v537_v12 = vld [vmem:[%s691_s1] sm:$0xff]  ;;  %vm314_vm1 = vcmask 31744   ;;  %v538_v13 = vld [vmem:[%s691_s1 + $0x8] sm:$0xff]  ;;  %vm383_vm2 = vcmask 261120  }
   0xe   : > { %286 = vperm.xlu1 %565, %v270_v0   ;;  %566 = vset.pattern.permute.xlu2 %v591_v1  ;;  %s252_s27 = scalar_lea.vmem %s690_s0, %s535_s24  ;;  %v274_v16 = vld [vmem:[%s694_s4] sm:$0xf]  ;;  %vm418_vm3 = vcmask 1043456   ;;  %s262_s23 = scalar_lea.vmem %s695_s5, %s535_s24 }
   0xf   : > { %v654_v3 = vld [vmem:[%s252_s27] sm:$0xff]  ;;  %296 = vperm.xlu0 %564, %v272_v2   ;;  %380 = vperm.xlu2 %566, %v274_v16  }
  0x10   : > { %277 = vst [vmem:[#allocation1] ss:$2 sm:$0xff] %v654_v3  ;;  %v269_v47 = vld [vmem:[%s693_s3] sm:$0x3] }
  0x16   : > { %291 = vperm.xlu1 %565, %v271_v4  }
  0x17   : > { %v278_v6 = vld.sshfl [vmem:[#allocation1] sm:$0xff pattern:$0x75316420]  ;;  %v279_v7 = vld.sshfl [vmem:[#allocation1 + $0x8] sm:$0xff pattern:$0x75316420]  ;;  %301 = vperm.xlu0 %564, %v273_v5  }
  0x18   : > { %v282_v8 = vpack.c.bf16 %v278_v6, %v278_v6  ;;  %v283_v9 = vpack.c.bf16 %v279_v7, %v279_v7 }
  0x1a   : > { %v323_v10 = vsel %vm321_vm0, %v282_v8, 0  ;;  %v326_v11 = vsel %vm321_vm0, %v283_v9, 0 }
  0x1b   : > { %335 = vmatpush.bf16.msra.mxu0 %v323_v10  ;;  %354 = vmatpush.bf16.msra.mxu1 %v326_v11 }
  0x1e   : > { %527 = vmatmul.msk.bf16.vlgmr.msra.gmra.mxu0 %vm314_vm1, %v537_v12  ;;  %529 = vmatmul.msk.bf16.vlgmr.msra.gmra.mxu1 %vm314_vm1, %v537_v12 }
  0x2e   : > { %528 = vmatmul.msk.bf16.gmra.mxu0 %vm314_vm1, %v538_v13  ;;  %530 = vmatmul.msk.bf16.gmra.mxu1 %vm314_vm1, %v538_v13 }
  0x69   : > { %v381_v48 = vpop.permute.xlu2 %380 }
  0x80   : > { %v287_v19 = vpop.permute.xlu1 %286 }
  0x81   : > { %v297_v20 = vpop.permute.xlu0 %296 }
  0x88   : > { %v292_v23 = vpop.permute.xlu1 %291 }
  0x89   : > { %v302_v24 = vpop.permute.xlu0 %301 }
  0x9b   : > { %v337_v14 = vpop.f32.mrf.mxu0  ;;  %v356_v15 = vpop.f32.mrf.mxu1 }
  0x9c   : > { %v338_v33 = vadd.f32 %v337_v14, %v287_v19  ;;  %v357_v34 = vadd.f32 %v356_v15, %v287_v19 }
  0x9e   : > { %v366_v43 = vmax.f32 %v338_v33, 0.0  ;;  %v367_v44 = vmax.f32 %v357_v34, 0.0 }
  0xa3   : > { %v339_v17 = vpop.f32.mrf.mxu0  ;;  %v358_v18 = vpop.f32.mrf.mxu1 }
  0xa4   : > { %v340_v29 = vadd.f32 %v339_v17, %v292_v23  ;;  %v359_v30 = vadd.f32 %v358_v18, %v292_v23 }
  0xa6   : > { %v368_v39 = vmax.f32 %v340_v29, 0.0  ;;  %v369_v40 = vmax.f32 %v359_v30, 0.0 }
  0xa8   : > { %v374_v45 = vpack.c.bf16 %v368_v39, %v366_v43  ;;  %v375_v46 = vpack.c.bf16 %v369_v40, %v367_v44 }
  0xab   : > { %v342_v21 = vpop.f32.mrf.mxu0  ;;  %v361_v22 = vpop.f32.mrf.mxu1 }
  0xac   : > { %v343_v25 = vadd.f32 %v342_v21, %v297_v20  ;;  %v362_v26 = vadd.f32 %v361_v22, %v297_v20 }
  0xae   : > { %v370_v35 = vmax.f32 %v343_v25, 0.0  ;;  %v371_v36 = vmax.f32 %v362_v26, 0.0 }
  0xb3   : > { %v344_v27 = vpop.f32.mrf.mxu0  ;;  %v363_v28 = vpop.f32.mrf.mxu1 }
  0xb4   : > { %v345_v31 = vadd.f32 %v344_v27, %v302_v24  ;;  %v364_v32 = vadd.f32 %v363_v28, %v302_v24 }
  0xb6   : > { %v372_v37 = vmax.f32 %v345_v31, 0.0  ;;  %v373_v38 = vmax.f32 %v364_v32, 0.0 }
  0xb8   : > { %v376_v41 = vpack.c.bf16 %v372_v37, %v370_v35  ;;  %v377_v42 = vpack.c.bf16 %v373_v38, %v371_v36 }
  0xba   : > { %393 = vmatpush.bf16.msra.mxu2 %v376_v41  ;;  %406 = vmatpush.bf16.msra.mxu3 %v377_v42 }
  0xbe   : > { %394 = vmatpush.bf16.msra.mxu2 %v374_v45  ;;  %407 = vmatpush.bf16.msra.mxu3 %v375_v46 }
  0xc1   : > { %531 = vmatmul.msk.bf16.vlgmr.msra.gmra.mxu2 %vm383_vm2, %v269_v47  ;;  %532 = vmatmul.msk.bf16.vlgmr.msra.gmra.mxu3 %vm383_vm2, %v269_v47 }
 0x144   : > { %v396_v49 = vpop.f32.mrf.mxu2  ;;  %v409_v50 = vpop.f32.mrf.mxu3 }
 0x145   : > { %v397_v51 = vadd.f32 %v396_v49, %v381_v48  ;;  %v410_v52 = vadd.f32 %v409_v50, %v381_v48 }
 0x147   : > { %v414_v53 = vmax.f32 %v410_v52, 0.0  ;;  %v413_v54 = vmax.f32 %v397_v51, 0.0 }
 0x149   : > { %v417_v55 = vrot.slane %v414_v53, 4 }
 0x14b   : > { %v419_v56 = vsel %vm418_vm3, %v413_v54, %v417_v55 }
 0x14c   : > { %v421_v57 = vsub.f32 %v654_v3, %v419_v56  ;;  %v398_v58 = vpop.f32.mrf.mxu2  ;;  %v411_v59 = vpop.f32.mrf.mxu3 }
 0x14e   : > { %422 = vst [vmem:[%s262_s23] sm:$0xff] %v421_v57 }
 0x14f PF: > { %s15_s20 = sadd.s32 1, %s589_s20   ;;  %s696_s18 = smov %s585_s19 }
 0x150   : > { %p12_p5 = scmp.ge.s32.totalorder %s15_s20, 4   ;;  %s697_s19 = smov %s699_s21 }
 0x152   :  { %14 = sbr.rel (!%p12_p5) target bundleno = 2 (0x2), region = 70 }

</bundles_post_ra>
